<compile_context>
chip_gen: v7x
topology: tpu7x:2x2x1
jax: 0.10.0
libtpu: 0.0.40
codegen_flags: <defaults>
</compile_context>

<pallas_src>
import functools
import math

import jax
import jax.numpy as jnp
from jax.experimental import pallas as pl
from jax.experimental.pallas import tpu as pltpu


# ----------------------------------------------------------------------------
# Kernel: one (block_rows, D) tile per grid step.
# ----------------------------------------------------------------------------
def layernorm_kernel(gamma_ref, beta_ref, x_ref, o_ref, *, eps):
    x = x_ref[...].astype(jnp.float32)                      # (block_rows, D)
    d = x.shape[-1]

    mean = jnp.mean(x, axis=-1, keepdims=True)
    c = x - mean
    # torch semantics: unbiased variance (D-1 divisor); eps added to std.
    var = jnp.sum(c * c, axis=-1, keepdims=True) * (1.0 / (d - 1))
    inv_std = pl.reciprocal(jnp.sqrt(var) + eps, approx=True)   # EUP slot, ~free

    y = (c * inv_std) * gamma_ref[...] + beta_ref[...]
    o_ref[...] = y.astype(o_ref.dtype)


def _pick_block_rows(n_rows, max_rows=1024):
    """Largest multiple-of-8 divisor of n_rows up to max_rows; else a single block."""
    best = None
    r = 8
    while r <= min(n_rows, max_rows):
        if n_rows % r == 0:
            best = r
        r += 8
    return best if best is not None else n_rows


# ----------------------------------------------------------------------------
# Wrapper: arbitrary leading dims, last dim = d_model.
# ----------------------------------------------------------------------------
def layer_norm_pallas(x, gamma, beta, *, eps=1e-8, block_rows=None):
    orig_shape = x.shape
    d = orig_shape[-1]
    n = math.prod(orig_shape[:-1]) if len(orig_shape) > 1 else 1

    x2 = x.reshape(n, d)
    g2 = gamma.reshape(1, d).astype(jnp.float32)
    b2 = beta.reshape(1, d).astype(jnp.float32)

    if block_rows is None:
        block_rows = _pick_block_rows(n)
    assert n % block_rows == 0, (n, block_rows)
    grid = (n // block_rows,)

    out = pl.pallas_call(
        functools.partial(layernorm_kernel, eps=eps),
        out_shape=jax.ShapeDtypeStruct((n, d), x.dtype),
        grid_spec=pltpu.PrefetchScalarGridSpec(
            num_scalar_prefetch=0,
            grid=grid,
            in_specs=[
                pl.BlockSpec((1, d), lambda i: (0, 0)),            # gamma (resident)
                pl.BlockSpec((1, d), lambda i: (0, 0)),            # beta  (resident)
                pl.BlockSpec((block_rows, d), lambda i: (i, 0)),   # x rows (streamed)
            ],
            out_specs=pl.BlockSpec((block_rows, d), lambda i: (i, 0)),
        ),
        compiler_params=pltpu.CompilerParams(
            dimension_semantics=("parallel",),                     # independent rows
        ),
    )(g2, b2, x2)

    return out.reshape(orig_shape)


# ----------------------------------------------------------------------------
# Pure-JAX reference mirroring the PyTorch forward exactly.
# ----------------------------------------------------------------------------
def layer_norm_ref(x, gamma, beta, eps=1e-8):
    mean = x.mean(-1, keepdims=True)
    var = ((x - mean) ** 2).sum(-1, keepdims=True) / (x.shape[-1] - 1)  # unbiased
    std = jnp.sqrt(var)
    return gamma * (x - mean) / (std + eps) + beta


if __name__ == "__main__":
    # Small shapes consistent with the module: (batch=2, seq=8, d_model=32).
    B, S, D = 2, 8, 32

    key = jax.random.PRNGKey(0)
    kx, kg, kb = jax.random.split(key, 3)
    x = jax.random.normal(kx, (B, S, D), jnp.float32)
    # The module initializes gamma=1, beta=0; use non-trivial values here so the
    # affine part of the kernel is actually exercised by the check.
    gamma = 1.0 + 0.1 * jax.random.normal(kg, (D,), jnp.float32)
    beta = 0.1 * jax.random.normal(kb, (D,), jnp.float32)

    # block_rows=8 forces a multi-step grid (2 row blocks) even at this tiny size,
    # exercising the streaming/tiling path.
    out = jax.block_until_ready(layer_norm_pallas(x, gamma, beta, block_rows=8))
    assert out.shape == (B, S, D), out.shape

    expected = layer_norm_ref(x, gamma, beta)
    max_err = float(jnp.max(jnp.abs(out - expected)))
    # Tolerance covers the EUP approx-reciprocal (values post-LN are O(1)).
    assert jnp.allclose(out, expected, rtol=1e-2, atol=1e-2), f"max_err={max_err}"

    print("KERNEL_OK")
</pallas_src>

<mosaic_0001>
module attributes {stable_mosaic.version = 11 : i64} {
  func.func @layernorm_kernel(%arg0: i32, %arg1: memref<1x32xf32, #tpu.memory_space<vmem>>, %arg2: memref<1x32xf32, #tpu.memory_space<vmem>>, %arg3: memref<8x32xf32, #tpu.memory_space<vmem>>, %arg4: memref<8x32xf32, #tpu.memory_space<vmem>>) attributes {dimension_semantics = [#tpu.dimension_semantics<parallel>], iteration_bounds = array<i64: 2>, scalar_prefetch = 0 : i64, scratch_operands = 0 : i64, tpu.core_type = #tpu.core_type<tc>, window_params = [{pipeline_mode = #tpu.pipeline_mode<synchronous>, transform_indices = @transform_0, window_bounds = array<i64: 1, 32>}, {pipeline_mode = #tpu.pipeline_mode<synchronous>, transform_indices = @transform_1, window_bounds = array<i64: 1, 32>}, {transform_indices = @transform_2, window_bounds = array<i64: 8, 32>}, {transform_indices = @transform_3, window_bounds = array<i64: 8, 32>}]} {
    %c0 = arith.constant 0 : index
    %c0_0 = arith.constant 0 : index
    %0 = vector.load %arg3[%c0, %c0_0] : memref<8x32xf32, #tpu.memory_space<vmem>>, vector<8x32xf32>
    %cst = arith.constant dense<0.000000e+00> : vector<8xf32>
    %1 = vector.multi_reduction <add>, %0, %cst [1] : vector<8x32xf32> to vector<8xf32>
    %2 = vector.shape_cast %1 : vector<8xf32> to vector<8x1xf32>
    %cst_1 = arith.constant 3.200000e+01 : f32
    %3 = vector.broadcast %cst_1 : f32 to vector<8x1xf32>
    %4 = arith.divf %2, %3 : vector<8x1xf32>
    %5 = vector.broadcast %4 : vector<8x1xf32> to vector<8x32xf32>
    %6 = arith.subf %0, %5 : vector<8x32xf32>
    %7 = arith.mulf %6, %6 : vector<8x32xf32>
    %cst_2 = arith.constant dense<0.000000e+00> : vector<8xf32>
    %8 = vector.multi_reduction <add>, %7, %cst_2 [1] : vector<8x32xf32> to vector<8xf32>
    %9 = vector.shape_cast %8 : vector<8xf32> to vector<8x1xf32>
    %cst_3 = arith.constant 0.0322580636 : f32
    %10 = vector.broadcast %cst_3 : f32 to vector<8x1xf32>
    %11 = arith.mulf %9, %10 : vector<8x1xf32>
    %12 = math.sqrt %11 : vector<8x1xf32>
    %cst_4 = arith.constant 9.99999993E-9 : f32
    %13 = vector.broadcast %cst_4 : f32 to vector<8x1xf32>
    %14 = arith.addf %12, %13 : vector<8x1xf32>
    %15 = tpu.reciprocal %14 {approx = true} : vector<8x1xf32> -> vector<8x1xf32>
    %16 = vector.broadcast %15 : vector<8x1xf32> to vector<8x32xf32>
    %17 = arith.mulf %6, %16 : vector<8x32xf32>
    %c0_5 = arith.constant 0 : index
    %c0_6 = arith.constant 0 : index
    %18 = vector.load %arg1[%c0_5, %c0_6] : memref<1x32xf32, #tpu.memory_space<vmem>>, vector<1x32xf32>
    %19 = vector.broadcast %18 : vector<1x32xf32> to vector<8x32xf32>
    %20 = arith.mulf %17, %19 : vector<8x32xf32>
    %c0_7 = arith.constant 0 : index
    %c0_8 = arith.constant 0 : index
    %21 = vector.load %arg2[%c0_7, %c0_8] : memref<1x32xf32, #tpu.memory_space<vmem>>, vector<1x32xf32>
    %22 = vector.broadcast %21 : vector<1x32xf32> to vector<8x32xf32>
    %23 = arith.addf %20, %22 : vector<8x32xf32>
    %c0_9 = arith.constant 0 : index
    %c0_10 = arith.constant 0 : index
    %24 = vector.load %arg4[%c0_9, %c0_10] : memref<8x32xf32, #tpu.memory_space<vmem>>, vector<8x32xf32>
    tpu.vector_store %arg4[%c0_9, %c0_10], %23 {strides = array<i32>} : memref<8x32xf32, #tpu.memory_space<vmem>>, vector<8x32xf32>,
    return
  }
  func.func @transform_0(%arg0: i32) -> (i32, i32) {
    %c0_i32 = arith.constant 0 : i32
    %c0_i32_0 = arith.constant 0 : i32
    %c0_i32_1 = arith.constant 0 : i32
    return %c0_i32, %c0_i32_0 : i32, i32
  }
  func.func @transform_1(%arg0: i32) -> (i32, i32) {
    %c0_i32 = arith.constant 0 : i32
    %c0_i32_0 = arith.constant 0 : i32
    %c0_i32_1 = arith.constant 0 : i32
    return %c0_i32, %c0_i32_0 : i32, i32
  }
  func.func @transform_2(%arg0: i32) -> (i32, i32) {
    %c0_i32 = arith.constant 0 : i32
    %c0_i32_0 = arith.constant 0 : i32
    return %arg0, %c0_i32 : i32, i32
  }
  func.func @transform_3(%arg0: i32) -> (i32, i32) {
    %c0_i32 = arith.constant 0 : i32
    %c0_i32_0 = arith.constant 0 : i32
    return %arg0, %c0_i32 : i32, i32
  }
}

</mosaic_0001>

<bundles_post_ra>
// kernel: tpu_custom_call.1
= control target key start
LH: loop header
LB: loop body
LE: loop exit
PB: predicated region body
PF: predicated region fallthrough
CT: control target
= control target key end

     0   :  { %8 = vsyncpa [#allocation3], 0  ;;  %s776_s0 = inlined_call_operand.hbm [shape: f32[1,32], index: 0, kind: input, shape index: {}]   ;;  %s777_s1 = inlined_call_operand.vmem [shape: f32[1,32], index: 1, kind: input, shape index: {}]   ;;  %s778_s2 = inlined_call_operand.hbm [shape: f32[16,32], index: 2, kind: input, shape index: {}]   ;;  %s779_s3 = inlined_call_operand.hbm [shape: f32[16,32], index: 3, kind: output, shape index: {}]  }
   0x1   :  { %9 = vsyncpa [#allocation6], 0 }
   0x2   :  { %11 = vsyncpa [#allocation6 + $0x1], 0 }
   0x3   :  { %12 = vsyncpa [#allocation4], 0 }
   0x4   :  { %14 = vsyncpa [#allocation4 + $0x1], 0  ;;  %s565_s12 = smov 0   ;;  %s567_s13 = smov 0  }
   0x5   :  { %s569_s14 = smov 0   ;;  %s571_s15 = smov 0  }
   0x6 LB: > { %s586_s16 = sadd.s32 4294967295, %s540_s15   ;;  %s335_s17 = sadd.s32 4294967294, %s540_s15   ;;  %s540_s15 = sphi %s571_s15, %s803_s15   ;;  %s536_s14 = sphi %s569_s14, %s802_s14   ;;  %s532_s13 = sphi %s567_s13, %s801_s13   ;;  %s528_s12 = sphi %s565_s12, %s800_s12  }
   0x7   : > { %p82_p0 = scmp.ne.s32.totalorder %s532_s13, %s528_s12  ;;  %p780_p1 = scmp.eq.s32.totalorder %s586_s16, 0 }
   0x8   : > { %p112_p3 = scmp.eq.s32.totalorder %s335_s17, 1  ;;  %p336_p5 = scmp.ge.s32.totalorder %s540_s15, 1 }
   0x9   : > { %p595_p4 = por %p780_p1, %p82_p0  ;;  %p119_p7 = scmp.lt.s32.totalorder %s540_s15, 3 }
   0xa   : > { %p600_p6 = por %p112_p3, %p82_p0  ;;  %s542_s21 = smov [#allocation2]  }
   0xb   : > { %s783_s18 = scalar_select %p595_p4, 1, 0 }
   0xc   : > { %s784_s19 = scalar_select %p600_p6, 1, 0 }
   0xd   : > { %p605_p8 = pnand %p336_p5, %p119_p7  ;;  %s132_s22 = sshll.u32 %s542_s21, 4  ;;  %s133_s22 = int_to_ptr.vmem [resolvable:$true] %s132_s22 }
   0xe   : > { %s613_s23 = sadd.s32 1, %s540_s15   ;;  %s69_s27 = sadd.s32 1, %s536_s14 }
   0xf   : > { %s785_s20 = scalar_select %p605_p8, 1, 0 }
  0x10   : > { %p359_p10 = pneg %p605_p8  ;;  %s66_s25 = ssub.s32 %s540_s15, %s613_s23 }
  0x11   : > { %p623_p12 = scmp.eq.s32.totalorder %s66_s25, 0  ;;  %s412_s30 = scalar_lea.hbm %s776_s0, 16 }
  0x12   : > { %p617_p11 = pnand %p359_p10, %p780_p1  ;;  %p413_p0 = scmp.ne.s32.totalorder %s776_s0, %s412_s30 }
  0x13   : > { %s787_s26 = scalar_select %p623_p12, 1, 0 }
  0x14   : > { %p414_p3 = pneg %p617_p11  ;;  %p419_p10 = scmp.lt.u32.totalorder %s412_s30, %s776_s0 }
  0x16   : > { %p415_p5 = pnand %p414_p3, %p413_p0 }
  0x18   : > { %p416_p7 = pneg %p415_p5 }
  0x1a   : > { %p421_p9 = pnand %p419_p10, %p416_p7 }
  0x1c   : > { %424 = shalt.err (!%p421_p9)
}
  0x1d   : > { %s425_s8 = scalar_lea.vmem %s133_s22, 16  ;;  %s432_s9 = scalar_lea.vmem %s133_s22, 32 }
  0x1e   : > { %p426_p1 = scmp.ne.s32.totalorder %s133_s22, %s425_s8  ;;  %p433_p6 = scmp.lt.s32.totalorder %s133_s22, %s133_s22 }
  0x1f   : > { %p434_p4 = scmp.lt.s32.totalorder %s432_s9, %s425_s8 }
  0x20   : > { %p428_p2 = pnand %p426_p1, %p414_p3 }
  0x21   : > { %p435_p8 = por %p434_p4, %p433_p6 }
  0x22   : > { %p429_p13 = pneg %p428_p2 }
  0x24   : > { %p436_p12 = pnand %p435_p8, %p429_p13 }
  0x26   : > { %439 = shalt.err (!%p436_p12)
}
  0x27   : > { %362 = dma.hbm_to_vmem [thread:$0]  (!%p617_p11), %s776_s0, 16, %s133_s22, [#allocation3]  }
  0x28   : > { %p788_p1 = scmp.ne.s32.totalorder %s787_s26, 0  ;;  %p77_p2 = scmp.eq.s32.totalorder %s540_s15, 0 }
  0x29   : > { %p789_p4 = scmp.ne.s32.totalorder %s536_s14, %s532_s13  ;;  %p790_p6 = scmp.eq.s32.totalorder %s586_s16, 1 }
  0x2a   : > { %s649_s17 = scalar_select %p788_p1, %s536_s14, %s69_s27  }
  0x2b   : > { %p657_p8 = por %p790_p6, %p789_p4  ;;  %p372_p9 = scmp.lt.s32.totalorder %s540_s15, 2 }
  0x2c   : > { %s146_s24 = sand.u32 1, %s536_s14   ;;  %p792_p12 = pmov %p789_p4 }
  0x2d   : > { %s339_s25 = sshll.u32 %s146_s24, 3  ;;  %s340_s28 = sshll.u32 %s540_s15, 7 }
  0x2e   : > { %p78_p13 = por %p77_p2, %p792_p12  ;;  %s670_s22 = scalar_lea.hbm %s778_s2, %s340_s28 }
  0x2f   : > { %s150_s26 = scalar_lea.vmem [#allocation5], %s339_s25  ;;  %s147_s5 = scalar_lea.sflag [#allocation6], %s146_s24 }
  0x30   : > { %s157_s27 = sshll.u32 %s150_s26, 4  ;;  %p672_p11 = pnand %p372_p9, %p78_p13  ;;  %s676_s27 = int_to_ptr.vmem [resolvable:$true] %s157_s27 }
  0x31   : > { %s440_s6 = scalar_lea.hbm %s670_s22, 128  ;;  %s445_s9 = scalar_lea.hbm %s778_s2, 256 }
  0x32   : > { %p441_p0 = scmp.ne.s32.totalorder %s670_s22, %s440_s6  ;;  %p442_p3 = pneg %p672_p11 }
  0x33   : > { %p446_p10 = scmp.lt.u32.totalorder %s670_s22, %s778_s2  ;;  %p447_p1 = scmp.lt.u32.totalorder %s445_s9, %s440_s6 }
  0x34   : > { %p443_p5 = pnand %p442_p3, %p441_p0  ;;  %p449_p4 = scmp.lt.u32.totalorder %s440_s6, %s670_s22 }
  0x35   : > { %p448_p2 = por %p447_p1, %p446_p10 }
  0x36   : > { %p444_p7 = pneg %p443_p5 }
  0x37   : > { %p450_p6 = por %p449_p4, %p448_p2 }
  0x39   : > { %p451_p9 = pnand %p450_p6, %p444_p7 }
  0x3b   : > { %454 = shalt.err (!%p451_p9)
}
  0x3c   : > { %s455_s24 = scalar_lea.vmem %s676_s27, 128  ;;  %s543_s25 = smov [#allocation5]  }
  0x3d   : > { %p456_p12 = scmp.ne.s32.totalorder %s676_s27, %s455_s24  ;;  %s460_s28 = sshll.u32 %s543_s25, 4  ;;  %s461_s28 = int_to_ptr.vmem [resolvable:$false] %s460_s28 }
  0x3e   : > { %s462_s29 = scalar_lea.vmem %s461_s28, 256  ;;  %p463_p5 = scmp.lt.s32.totalorder %s676_s27, %s461_s28 }
  0x3f   : > { %p458_p13 = pnand %p456_p12, %p442_p3  ;;  %p464_p10 = scmp.lt.s32.totalorder %s462_s29, %s455_s24 }
  0x41   : > { %p459_p0 = pneg %p458_p13  ;;  %p465_p1 = por %p464_p10, %p463_p5 }
  0x43   : > { %p466_p2 = pnand %p465_p1, %p459_p0 }
  0x45   : > { %469 = shalt.err (!%p466_p2)
}
  0x46   : > { %366 = dma.hbm_to_vmem [thread:$0]  (!%p672_p11), %s670_s22, 128, %s676_s27, %s147_s5  }
  0x47   : > { %p794_p7 = scmp.ne.s32.totalorder %s785_s20, 0 }
  0x48   : > { %p795_p3 = scmp.eq.s32.totalorder (!%p794_p7), %s586_s16, 0 }
  0x49   : > { %166 = sbr.rel (%p794_p7) target bundleno = 428 (0x1ac), region = 32 }
  0x50   : > { %515 = dma.done.wait (%p795_p3), [#allocation3], 16   ;;  %p796_p4 = pmov %p795_p3 }
  0x51   : > { %s710_s30 = sand.u32 1, %s532_s13   ;;  %p797_p11 = scmp.ne.s32.totalorder %s783_s18, 0 }
  0x52   : > { %517 = vsyncadd (%p796_p4), [#allocation3], 4294967280  ;;  %s343_s26 = sshll.u32 %s710_s30, 3  ;;  %s173_s4 = scalar_lea.sflag [#allocation6], %s710_s30 }
  0x53   : > { %s176_s22 = scalar_lea.vmem [#allocation5], %s343_s26 }
  0x54   : > { %519 = dma.done.wait (%p797_p11), %s173_s4, 128  }
  0x55   : > { %521 = vsyncadd (%p797_p11), %s173_s4, 4294967168  ;;  %vm200_vm0 = vcmask 261120   ;;  %v199_v0 = vld [vmem:[%s176_s22] sm:$0xff]  ;;  %v345_v16 = vld [vmem:[#allocation2] ss:$0 sm:$0xff]  ;;  %s348_s27 = sshll.u32 %s586_s16, 7 }
  0x56   : > { %v201_v1 = vsel %vm200_vm0, %v199_v0, 0.0  ;;  %v346_v18 = vld [vmem:[%s777_s1] ss:$0 sm:$0xff]  ;;  %s198_s5 = scalar_lea.vmem [#allocation7], %s343_s26  ;;  %s731_s9 = scalar_lea.hbm %s779_s3, %s348_s27 }
  0x57   : > { %202 = vadd.xlane.f32.xlu0 %v201_v1  ;;  %s253_s6 = sshll.u32 %s198_s5, 4  ;;  %s240_s10 = scalar_lea.sflag [#allocation4], %s710_s30  ;;  %s733_s6 = int_to_ptr.vmem [resolvable:$true] %s253_s6 }
  0x58   : > { %s470_s11 = scalar_lea.vmem %s733_s6, 128  ;;  %s544_s16 = smov [#allocation7]  }
  0x59   : > { %p471_p6 = scmp.ne.s32.totalorder %s733_s6, %s470_s11  ;;  %s474_s24 = sshll.u32 %s544_s16, 4  ;;  %s475_s24 = int_to_ptr.vmem [resolvable:$false] %s474_s24 }
  0x5a   : > { %s476_s25 = scalar_lea.vmem %s475_s24, 256  ;;  %p477_p13 = scmp.lt.s32.totalorder %s733_s6, %s475_s24 }
  0x5b   : > { %p472_p9 = pnand %p471_p6, %p657_p8  ;;  %p478_p0 = scmp.lt.s32.totalorder %s476_s25, %s470_s11 }
  0x5d   : > { %p473_p12 = pneg %p472_p9  ;;  %p479_p5 = por %p478_p0, %p477_p13 }
  0x5f   : > { %p480_p10 = pnand %p479_p5, %p473_p12 }
  0xe4   : > { %v203_v2 = vpop.xlane.xlu0 %202 }
  0xe5   : > { %v205_v3 = vmul.f32 0.03125, %v203_v2 }
  0xe7   : > { %v206_v4 = vsub.f32 %v199_v0, %v205_v3 }
  0xe9   : > { %v207_v5 = vmul.f32 %v206_v4, %v206_v4 }
  0xeb   : > { %v208_v6 = vsel %vm200_vm0, %v207_v5, 0.0 }
  0xec   : > { %209 = vadd.xlane.f32.xlu0 %v208_v6 }
 0x179   : > { %v210_v7 = vpop.xlane.xlu0 %209 }
 0x17a   : > { %v211_v8 = vmul.f32 0.032258064, %v210_v7 }
 0x17c   : > { %408 = vrsqrt.f32 %v211_v8  ;;  %vm214_vm1 = vcmp.eq.f32.partialorder %v211_v8, inf  ;;  %v217_v11 = vand.u32 2147483648, %v211_v8  ;;  %vm216_vm2 = vcmp.eq.f32.partialorder %v211_v8, 0.0 }
 0x186   : > { %v409_v9 = vpop.eup %408 }
 0x187   : > { %v213_v10 = vmul.f32 %v409_v9, %v211_v8 }
 0x189   : > { %v215_v12 = vsel %vm214_vm1, %v211_v8, %v213_v10 }
 0x18a   : > { %v218_v13 = vsel %vm216_vm2, %v217_v11, %v215_v12 }
 0x18b   : > { %v219_v14 = vadd.f32 1e-08, %v218_v13 }
 0x18d   : > { %410 = vrcp.f32 %v219_v14 }
 0x197   : > { %v411_v15 = vpop.eup %410 }
 0x198   : > { %v221_v17 = vmul.f32 %v411_v15, %v206_v4 }
 0x19a   : > { %v229_v19 = vmul.f32 %v345_v16, %v221_v17 }
 0x19c   : > { %v237_v20 = vadd.f32 %v346_v18, %v229_v19 }
 0x19e   : > { %238 = vst.msk [vmem:[%s198_s5] sm:$0xff] %vm200_vm0, %v237_v20 }
 0x19f   : > { %483 = shalt.err (!%p480_p10)
}
 0x1a0   : > { %s484_s28 = scalar_lea.hbm %s731_s9, 128  ;;  %s488_s26 = scalar_lea.hbm %s779_s3, 256 }
 0x1a1   : > { %p485_p1 = scmp.ne.s32.totalorder %s731_s9, %s484_s28  ;;  %p489_p3 = scmp.lt.u32.totalorder %s731_s9, %s779_s3 }
 0x1a2   : > { %p490_p4 = scmp.lt.u32.totalorder %s488_s26, %s484_s28  ;;  %p492_p6 = scmp.lt.u32.totalorder %s484_s28, %s731_s9 }
 0x1a3   : > { %p486_p2 = pnand %p485_p1, %p657_p8 }
 0x1a4   : > { %p491_p11 = por %p490_p4, %p489_p3 }
 0x1a5   : > { %p487_p7 = pneg %p486_p2 }
 0x1a6   : > { %p493_p9 = por %p492_p6, %p491_p11 }
 0x1a8   : > { %p494_p12 = pnand %p493_p9, %p487_p7 }
 0x1aa   : > { %497 = shalt.err (!%p494_p12)
}
 0x1ab   : > { %357 = dma.vmem_to_hbm [thread:$0]  (%p657_p8), %s733_s6, 128, %s731_s9, %s240_s10  }
 0x1ac PF: > { %s265_s18 = sand.u32 1, %s528_s12   ;;  %p798_p13 = scmp.ne.s32.totalorder %s784_s19, 0 }
 0x1ad   : > { %p799_p0 = scmp.ge.s32.totalorder %s540_s15, 2  ;;  %s266_s20 = scalar_lea.sflag [#allocation4], %s265_s18 }
 0x1af   : > { %p368_p5 = pnand %p799_p0, %p798_p13 }
 0x1b1   : > { %523 = dma.done.wait (!%p368_p5), %s266_s20, 128  }
 0x1b2   : > { %525 = vsyncadd (!%p368_p5), %s266_s20, 4294967168  ;;  %p17_p10 = scmp.ge.s32.totalorder %s613_s23, 4   ;;  %s800_s12 = smov %s532_s13 }
 0x1b3   : > { %s801_s13 = smov %s536_s14  ;;  %s802_s14 = smov %s649_s17 }
 0x1b4   : > { %s803_s15 = smov %s613_s23  ;;  %19 = sbr.rel (!%p17_p10) target bundleno = 6 (0x6), region = 82 }
 0x1bb   :  { %271 = vsyncpa [#allocation3], 1 }
 0x1bc   :  { %273 = vsyncpa [#allocation3 + $0x1], 1 }
 0x1bd   :  { %274 = vsyncpa [#allocation6], 1 }
 0x1be   :  { %276 = vsyncpa [#allocation6 + $0x1], 1 }
 0x1bf   :  { %277 = vsyncpa [#allocation4], 1 }
 0x1c0   :  { %279 = vsyncpa [#allocation4 + $0x1], 1 }

</bundles_post_ra>
